<compile_context>
chip_gen: v6e
topology: v6e:2x2x1
jax: 0.10.0
libtpu: 0.0.40
codegen_flags: <defaults>
</compile_context>

<pallas_src>
import math
from functools import partial

import jax
import jax.numpy as jnp
from jax.experimental import pallas as pl
from jax.experimental.pallas import tpu as pltpu


# ---------------------------------------------------------------------------
# Kernel 1: degradation MLP.  One batch per grid step.
#   in : values (1, S, H*D=128) block, w1 (128,64), b1 (1,64), w2 row (1,64),
#        b2 (1,1)
#   out: (S, 1) block of the (B*S, 1) score array
# ---------------------------------------------------------------------------
def _degradation_kernel(v_ref, w1_ref, b1_ref, w2r_ref, b2_ref, out_ref):
    x = v_ref[0]                                                      # (S, 128)
    h = jnp.dot(x, w1_ref[...], preferred_element_type=jnp.float32)  # (S, 64)
    h = jnp.maximum(h + b1_ref[...], 0.0)                            # ReLU
    # Second layer (64 -> 1) as a VPU multiply + cross-lane sum (not an N=1
    # MXU matmul).
    s = jnp.sum(h * w2r_ref[...], axis=-1, keepdims=True) + b2_ref[...]   # (S, 1)
    s = jax.nn.sigmoid(s)
    s = jnp.clip(s, 0.01, 0.99)                                       # torch.clamp
    out_ref[...] = s.astype(out_ref.dtype)


def degradation_scores(v2, w1, b1, w2, b2):
    """v2: (B, S, H*D) with H*D == 128  ->  (B, S) degradation scores."""
    B, S, HD = v2.shape
    hid = w1.shape[1]
    w2_row = w2.reshape(1, hid).astype(jnp.float32)                   # (1, 64)
    b2_2d = b2.reshape(1, 1).astype(jnp.float32)
    b1_2d = b1.reshape(1, hid).astype(jnp.float32)

    out = pl.pallas_call(
        _degradation_kernel,
        out_shape=jax.ShapeDtypeStruct((B * S, 1), jnp.float32),
        grid_spec=pltpu.PrefetchScalarGridSpec(
            num_scalar_prefetch=0,
            grid=(B,),
            in_specs=[
                pl.BlockSpec((1, S, HD), lambda b: (b, 0, 0)),        # values tile
                pl.BlockSpec((HD, hid), lambda b: (0, 0)),            # w1 (whole)
                pl.BlockSpec((1, hid), lambda b: (0, 0)),             # b1
                pl.BlockSpec((1, hid), lambda b: (0, 0)),             # w2 row
                pl.BlockSpec((1, 1), lambda b: (0, 0)),               # b2
            ],
            out_specs=pl.BlockSpec((S, 1), lambda b: (b, 0)),
        ),
        compiler_params=pltpu.CompilerParams(
            dimension_semantics=("parallel",)),
    )(v2, w1.astype(jnp.float32), b1_2d, w2_row, b2_2d)
    return out.reshape(B, S)                                          # free reshape


# ---------------------------------------------------------------------------
# Kernel 2: attention.  One batch per grid step; all H heads inside.
#   blocks: deg (1,1,S), q (1,L,H*E), k (1,S,H*E), v (1,S,H*D), out (1,L,H*D)
# ---------------------------------------------------------------------------
def _attention_kernel(deg_ref, q_ref, k_ref, v_ref, o_ref, *, scale, H, E, D):
    deg_scaled = scale * deg_ref[0]                                   # (1, S) f32
    q_all = q_ref[0]                                                  # (L, H*E)
    k_all = k_ref[0]                                                  # (S, H*E)
    v_all = v_ref[0]                                                  # (S, H*D)

    for h in range(H):                                                # static unroll
        q = q_all[:, h * E:(h + 1) * E]                               # (L, E)
        k = k_all[:, h * E:(h + 1) * E]                               # (S, E)
        v = v_all[:, h * D:(h + 1) * D]                               # (S, D)

        # scores[l, s] = sum_e q[l, e] * k[s, e]
        s = jax.lax.dot_general(
            q, k, (((1,), (1,)), ((), ())),
            preferred_element_type=jnp.float32)                       # (L, S) f32

        # scale*(scores + deg) ; the reference's "deg - max(deg)" is a constant
        # shift along the softmax axis -> identical softmax, so it is dropped.
        logits = scale * s + deg_scaled                               # (L, S)
        logits = logits - jnp.max(logits, axis=-1, keepdims=True)
        p = jnp.exp(logits)
        a = p * pl.reciprocal(jnp.sum(p, axis=-1, keepdims=True), approx=False)

        # V[l, d] = sum_s A[l, s] * v[s, d]
        o = jnp.dot(a.astype(v.dtype), v, preferred_element_type=jnp.float32)

        # lane slice of the lane-dense (1, L, H*D) output block
        o_ref[0, :, h * D:(h + 1) * D] = o.astype(o_ref.dtype)


def d_full_attention(queries, keys, values, w1, b1, w2, b2, scale=None):
    """queries (B,L,H,E), keys (B,S,H,E), values (B,S,H,D) -> (B,L,H,D)."""
    B, L, H, E = queries.shape
    _, S, _, D = values.shape
    if scale is None:                      # exact PyTorch parity (scale=0.0 honored)
        scale = 1.0 / math.sqrt(E)

    # Free contiguous trailing-dim merges — NO HBM transposes.
    q2 = queries.reshape(B, L, H * E)
    k2 = keys.reshape(B, S, H * E)
    v2 = values.reshape(B, S, H * D)

    deg = degradation_scores(v2, w1, b1, w2, b2)                      # (B, S) f32
    deg3 = deg.reshape(B, 1, S)                                       # free reshape

    # VMEM budget from the actual double-buffered tile footprint (+ headroom).
    itemsize = 4
    step_bytes = itemsize * (S + L * H * E + S * H * E + S * H * D + L * H * D)
    vmem_limit = int(min(128 * 1024 * 1024, max(32 * 1024 * 1024, 4 * step_bytes)))

    out = pl.pallas_call(
        partial(_attention_kernel, scale=scale, H=H, E=E, D=D),
        out_shape=jax.ShapeDtypeStruct((B, L, H * D), queries.dtype),
        grid_spec=pltpu.PrefetchScalarGridSpec(
            num_scalar_prefetch=0,
            grid=(B,),
            in_specs=[
                pl.BlockSpec((1, 1, S), lambda b: (b, 0, 0)),         # deg row
                pl.BlockSpec((1, L, H * E), lambda b: (b, 0, 0)),     # q tile
                pl.BlockSpec((1, S, H * E), lambda b: (b, 0, 0)),     # k tile
                pl.BlockSpec((1, S, H * D), lambda b: (b, 0, 0)),     # v tile
            ],
            out_specs=pl.BlockSpec((1, L, H * D), lambda b: (b, 0, 0)),
        ),
        compiler_params=pltpu.CompilerParams(
            dimension_semantics=("parallel",),
            vmem_limit_bytes=vmem_limit),
    )(deg3, q2, k2, v2)

    return out.reshape(B, L, H, D)                                    # free reshape


# ---------------------------------------------------------------------------
# Pure-JAX reference of the PyTorch forward (eval mode, mask_flag=False).
# ---------------------------------------------------------------------------
def _reference(queries, keys, values, w1, b1, w2, b2):
    B, L, H, E = queries.shape
    _, S, _, D = values.shape
    scale = 1.0 / math.sqrt(E)
    scores = jnp.einsum('blhe,bshe->bhls', queries, keys)
    vflat = values.reshape(B * S, H * D)
    hmid = jnp.maximum(vflat @ w1 + b1, 0.0)
    deg = jnp.clip(jax.nn.sigmoid(hmid @ w2 + b2), 0.01, 0.99).reshape(B, S)
    deg_adj = deg - deg.max(axis=-1, keepdims=True)
    scores = scores + deg_adj[:, None, None, :]
    A = jax.nn.softmax(scale * scores, axis=-1)
    return jnp.einsum('bhls,bshd->blhd', A, values)


if __name__ == "__main__":
    # Shapes: H*D must equal 128 for the degradation net's Linear(128, 64).
    B, L, S, H, E, D = 2, 8, 8, 4, 32, 32

    key = jax.random.PRNGKey(0)
    kq, kk, kv, kw1, kb1, kw2, kb2 = jax.random.split(key, 7)

    queries = jax.random.normal(kq, (B, L, H, E), dtype=jnp.float32)
    keys_ = jax.random.normal(kk, (B, S, H, E), dtype=jnp.float32)
    values = jax.random.normal(kv, (B, S, H, D), dtype=jnp.float32)

    # Degradation net parameters (deterministic synthetic init).
    w1 = jax.random.normal(kw1, (H * D, 64), dtype=jnp.float32) * (1.0 / math.sqrt(H * D))
    b1 = jax.random.normal(kb1, (1, 64), dtype=jnp.float32) * 0.01
    w2 = jax.random.normal(kw2, (64, 1), dtype=jnp.float32) * (1.0 / math.sqrt(64))
    b2 = jax.random.normal(kb2, (1, 1), dtype=jnp.float32) * 0.01

    fn = jax.jit(d_full_attention)
    out = fn(queries, keys_, values, w1, b1, w2, b2)
    out = jax.block_until_ready(out)

    ref = _reference(queries, keys_, values, w1, b1, w2, b2)
    assert out.shape == (B, L, H, D)
    assert bool(jnp.allclose(out, ref, atol=1e-5, rtol=1e-5))

    print("KERNEL_OK")
</pallas_src>

<mosaic_0001>
module attributes {stable_mosaic.version = 11 : i64} {
  func.func @_degradation_kernel(%arg0: i32, %arg1: memref<1x8x128xf32, #tpu.memory_space<vmem>>, %arg2: memref<128x64xf32, #tpu.memory_space<vmem>>, %arg3: memref<1x64xf32, #tpu.memory_space<vmem>>, %arg4: memref<1x64xf32, #tpu.memory_space<vmem>>, %arg5: memref<1x1xf32, #tpu.memory_space<vmem>>, %arg6: memref<8x1xf32, #tpu.memory_space<vmem>>) attributes {dimension_semantics = [#tpu.dimension_semantics<parallel>], iteration_bounds = array<i64: 2>, scalar_prefetch = 0 : i64, scratch_operands = 0 : i64, tpu.core_type = #tpu.core_type<tc>, window_params = [{transform_indices = @transform_0, window_bounds = array<i64: 1, 8, 128>}, {pipeline_mode = #tpu.pipeline_mode<synchronous>, transform_indices = @transform_1, window_bounds = array<i64: 128, 64>}, {pipeline_mode = #tpu.pipeline_mode<synchronous>, transform_indices = @transform_2, window_bounds = array<i64: 1, 64>}, {pipeline_mode = #tpu.pipeline_mode<synchronous>, transform_indices = @transform_3, window_bounds = array<i64: 1, 64>}, {pipeline_mode = #tpu.pipeline_mode<synchronous>, transform_indices = @transform_4, window_bounds = array<i64: 1, 1>}, {transform_indices = @transform_5, window_bounds = array<i64: 8, 1>}]} {
    %c0 = arith.constant 0 : index
    %c0_0 = arith.constant 0 : index
    %c0_1 = arith.constant 0 : index
    %0 = vector.load %arg1[%c0, %c0_0, %c0_1] : memref<1x8x128xf32, #tpu.memory_space<vmem>>, vector<1x8x128xf32>
    %1 = vector.shape_cast %0 : vector<1x8x128xf32> to vector<8x128xf32>
    %c0_2 = arith.constant 0 : index
    %c0_3 = arith.constant 0 : index
    %2 = vector.load %arg2[%c0_2, %c0_3] : memref<128x64xf32, #tpu.memory_space<vmem>>, vector<128x64xf32>
    %cst = arith.constant dense<0.000000e+00> : vector<8x64xf32>
    %3 = tpu.matmul %1, %2, %cst {dimension_numbers = #tpu.dot_dimension_numbers<[1], [0], [0], [1], [0, 0, 1, 1], [], []>} : vector<8x128xf32>, vector<128x64xf32>, vector<8x64xf32> -> vector<8x64xf32>
    %c0_4 = arith.constant 0 : index
    %c0_5 = arith.constant 0 : index
    %4 = vector.load %arg3[%c0_4, %c0_5] : memref<1x64xf32, #tpu.memory_space<vmem>>, vector<1x64xf32>
    %5 = vector.broadcast %4 : vector<1x64xf32> to vector<8x64xf32>
    %6 = arith.addf %3, %5 : vector<8x64xf32>
    %cst_6 = arith.constant 0.000000e+00 : f32
    %7 = vector.broadcast %cst_6 : f32 to vector<8x64xf32>
    %8 = arith.maximumf %6, %7 : vector<8x64xf32>
    %c0_7 = arith.constant 0 : index
    %c0_8 = arith.constant 0 : index
    %9 = vector.load %arg4[%c0_7, %c0_8] : memref<1x64xf32, #tpu.memory_space<vmem>>, vector<1x64xf32>
    %10 = vector.broadcast %9 : vector<1x64xf32> to vector<8x64xf32>
    %11 = arith.mulf %8, %10 : vector<8x64xf32>
    %cst_9 = arith.constant dense<0.000000e+00> : vector<8xf32>
    %12 = vector.multi_reduction <add>, %11, %cst_9 [1] : vector<8x64xf32> to vector<8xf32>
    %13 = vector.shape_cast %12 : vector<8xf32> to vector<8x1xf32>
    %c0_10 = arith.constant 0 : index
    %c0_11 = arith.constant 0 : index
    %14 = vector.load %arg5[%c0_10, %c0_11] : memref<1x1xf32, #tpu.memory_space<vmem>>, vector<1x1xf32>
    %15 = vector.broadcast %14 : vector<1x1xf32> to vector<8x1xf32>
    %16 = arith.addf %13, %15 : vector<8x1xf32>
    %17 = arith.negf %16 : vector<8x1xf32>
    %18 = math.exp %17 : vector<8x1xf32>
    %cst_12 = arith.constant 1.000000e+00 : f32
    %19 = vector.broadcast %cst_12 : f32 to vector<8x1xf32>
    %20 = arith.addf %19, %18 : vector<8x1xf32>
    %21 = arith.divf %19, %20 : vector<8x1xf32>
    %cst_13 = arith.constant 0.00999999977 : f32
    %cst_14 = arith.constant 9.900000e-01 : f32
    %22 = vector.broadcast %cst_13 : f32 to vector<8x1xf32>
    %23 = arith.maximumf %22, %21 : vector<8x1xf32>
    %24 = vector.broadcast %cst_14 : f32 to vector<8x1xf32>
    %25 = arith.minimumf %24, %23 : vector<8x1xf32>
    %c0_15 = arith.constant 0 : index
    %c0_16 = arith.constant 0 : index
    %26 = vector.load %arg6[%c0_15, %c0_16] : memref<8x1xf32, #tpu.memory_space<vmem>>, vector<8x1xf32>
    tpu.vector_store %arg6[%c0_15, %c0_16], %25 {strides = array<i32>} : memref<8x1xf32, #tpu.memory_space<vmem>>, vector<8x1xf32>,
    return
  }
  func.func @transform_0(%arg0: i32) -> (i32, i32, i32) {
    %c0_i32 = arith.constant 0 : i32
    %c0_i32_0 = arith.constant 0 : i32
    %c0_i32_1 = arith.constant 0 : i32
    return %arg0, %c0_i32, %c0_i32_0 : i32, i32, i32
  }
  func.func @transform_1(%arg0: i32) -> (i32, i32) {
    %c0_i32 = arith.constant 0 : i32
    %c0_i32_0 = arith.constant 0 : i32
    %c0_i32_1 = arith.constant 0 : i32
    return %c0_i32, %c0_i32_0 : i32, i32
  }
  func.func @transform_2(%arg0: i32) -> (i32, i32) {
    %c0_i32 = arith.constant 0 : i32
    %c0_i32_0 = arith.constant 0 : i32
    %c0_i32_1 = arith.constant 0 : i32
    return %c0_i32, %c0_i32_0 : i32, i32
  }
  func.func @transform_3(%arg0: i32) -> (i32, i32) {
    %c0_i32 = arith.constant 0 : i32
    %c0_i32_0 = arith.constant 0 : i32
    %c0_i32_1 = arith.constant 0 : i32
    return %c0_i32, %c0_i32_0 : i32, i32
  }
  func.func @transform_4(%arg0: i32) -> (i32, i32) {
    %c0_i32 = arith.constant 0 : i32
    %c0_i32_0 = arith.constant 0 : i32
    %c0_i32_1 = arith.constant 0 : i32
    return %c0_i32, %c0_i32_0 : i32, i32
  }
  func.func @transform_5(%arg0: i32) -> (i32, i32) {
    %c0_i32 = arith.constant 0 : i32
    %c0_i32_0 = arith.constant 0 : i32
    return %arg0, %c0_i32 : i32, i32
  }
}

module attributes {stable_mosaic.version = 11 : i64} {
  func.func @_attention_kernel(%arg0: i32, %arg1: memref<1x1x8xf32, #tpu.memory_space<vmem>>, %arg2: memref<1x8x128xf32, #tpu.memory_space<vmem>>, %arg3: memref<1x8x128xf32, #tpu.memory_space<vmem>>, %arg4: memref<1x8x128xf32, #tpu.memory_space<vmem>>, %arg5: memref<1x8x128xf32, #tpu.memory_space<vmem>>) attributes {dimension_semantics = [#tpu.dimension_semantics<parallel>], iteration_bounds = array<i64: 2>, scalar_prefetch = 0 : i64, scratch_operands = 0 : i64, tpu.core_type = #tpu.core_type<tc>, window_params = [{transform_indices = @transform_0, window_bounds = array<i64: 1, 1, 8>}, {transform_indices = @transform_1, window_bounds = array<i64: 1, 8, 128>}, {transform_indices = @transform_2, window_bounds = array<i64: 1, 8, 128>}, {transform_indices = @transform_3, window_bounds = array<i64: 1, 8, 128>}, {transform_indices = @transform_4, window_bounds = array<i64: 1, 8, 128>}]} {
    %c0 = arith.constant 0 : index
    %c0_0 = arith.constant 0 : index
    %c0_1 = arith.constant 0 : index
    %0 = vector.load %arg1[%c0, %c0_0, %c0_1] : memref<1x1x8xf32, #tpu.memory_space<vmem>>, vector<1x1x8xf32>
    %1 = vector.shape_cast %0 : vector<1x1x8xf32> to vector<1x8xf32>
    %cst = arith.constant 0.176776692 : f32
    %2 = vector.broadcast %cst : f32 to vector<1x8xf32>
    %3 = arith.mulf %2, %1 : vector<1x8xf32>
    %c0_2 = arith.constant 0 : index
    %c0_3 = arith.constant 0 : index
    %c0_4 = arith.constant 0 : index
    %4 = vector.load %arg2[%c0_2, %c0_3, %c0_4] : memref<1x8x128xf32, #tpu.memory_space<vmem>>, vector<1x8x128xf32>
    %5 = vector.shape_cast %4 : vector<1x8x128xf32> to vector<8x128xf32>
    %c0_5 = arith.constant 0 : index
    %c0_6 = arith.constant 0 : index
    %c0_7 = arith.constant 0 : index
    %6 = vector.load %arg3[%c0_5, %c0_6, %c0_7] : memref<1x8x128xf32, #tpu.memory_space<vmem>>, vector<1x8x128xf32>
    %7 = vector.shape_cast %6 : vector<1x8x128xf32> to vector<8x128xf32>
    %c0_8 = arith.constant 0 : index
    %c0_9 = arith.constant 0 : index
    %c0_10 = arith.constant 0 : index
    %8 = vector.load %arg4[%c0_8, %c0_9, %c0_10] : memref<1x8x128xf32, #tpu.memory_space<vmem>>, vector<1x8x128xf32>
    %9 = vector.shape_cast %8 : vector<1x8x128xf32> to vector<8x128xf32>
    %10 = vector.extract_strided_slice %5 {offsets = [0, 0], sizes = [8, 32], strides = [1, 1]} : vector<8x128xf32> to vector<8x32xf32>
    %11 = vector.extract_strided_slice %7 {offsets = [0, 0], sizes = [8, 32], strides = [1, 1]} : vector<8x128xf32> to vector<8x32xf32>
    %12 = vector.extract_strided_slice %9 {offsets = [0, 0], sizes = [8, 32], strides = [1, 1]} : vector<8x128xf32> to vector<8x32xf32>
    %cst_11 = arith.constant dense<0.000000e+00> : vector<8x8xf32>
    %13 = tpu.matmul %10, %11, %cst_11 {dimension_numbers = #tpu.dot_dimension_numbers<[1], [1], [0], [0], [0, 0, 1, 0], [], []>} : vector<8x32xf32>, vector<8x32xf32>, vector<8x8xf32> -> vector<8x8xf32>
    %cst_12 = arith.constant 0.176776692 : f32
    %14 = vector.broadcast %cst_12 : f32 to vector<8x8xf32>
    %15 = arith.mulf %14, %13 : vector<8x8xf32>
    %16 = vector.broadcast %3 : vector<1x8xf32> to vector<8x8xf32>
    %17 = arith.addf %15, %16 : vector<8x8xf32>
    %cst_13 = arith.constant dense<0xFF800000> : vector<8xf32>
    %18 = vector.multi_reduction <maximumf>, %17, %cst_13 [1] : vector<8x8xf32> to vector<8xf32>
    %19 = vector.shape_cast %18 : vector<8xf32> to vector<8x1xf32>
    %20 = vector.broadcast %19 : vector<8x1xf32> to vector<8x8xf32>
    %21 = arith.subf %17, %20 : vector<8x8xf32>
    %22 = math.exp %21 : vector<8x8xf32>
    %cst_14 = arith.constant dense<0.000000e+00> : vector<8xf32>
    %23 = vector.multi_reduction <add>, %22, %cst_14 [1] : vector<8x8xf32> to vector<8xf32>
    %24 = vector.shape_cast %23 : vector<8xf32> to vector<8x1xf32>
    %25 = tpu.reciprocal %24 : vector<8x1xf32> -> vector<8x1xf32>
    %26 = vector.broadcast %25 : vector<8x1xf32> to vector<8x8xf32>
    %27 = arith.mulf %22, %26 : vector<8x8xf32>
    %cst_15 = arith.constant dense<0.000000e+00> : vector<8x32xf32>
    %28 = tpu.matmul %27, %12, %cst_15 {dimension_numbers = #tpu.dot_dimension_numbers<[1], [0], [0], [1], [0, 0, 1, 1], [], []>} : vector<8x8xf32>, vector<8x32xf32>, vector<8x32xf32> -> vector<8x32xf32>
    %c0_16 = arith.constant 0 : index
    %c0_17 = arith.constant 0 : index
    %c0_18 = arith.constant 0 : index
    %29 = vector.load %arg5[%c0_16, %c0_17, %c0_18] : memref<1x8x128xf32, #tpu.memory_space<vmem>>, vector<1x8x32xf32>
    %30 = vector.shape_cast %29 : vector<1x8x32xf32> to vector<8x32xf32>
    %31 = vector.shape_cast %28 : vector<8x32xf32> to vector<1x8x32xf32>
    tpu.vector_store %arg5[%c0_16, %c0_17, %c0_18], %31 {strides = array<i32>} : memref<1x8x128xf32, #tpu.memory_space<vmem>>, vector<1x8x32xf32>,
    %32 = vector.extract_strided_slice %5 {offsets = [0, 32], sizes = [8, 32], strides = [1, 1]} : vector<8x128xf32> to vector<8x32xf32>
    %33 = vector.extract_strided_slice %7 {offsets = [0, 32], sizes = [8, 32], strides = [1, 1]} : vector<8x128xf32> to vector<8x32xf32>
    %34 = vector.extract_strided_slice %9 {offsets = [0, 32], sizes = [8, 32], strides = [1, 1]} : vector<8x128xf32> to vector<8x32xf32>
    %cst_19 = arith.constant dense<0.000000e+00> : vector<8x8xf32>
    %35 = tpu.matmul %32, %33, %cst_19 {dimension_numbers = #tpu.dot_dimension_numbers<[1], [1], [0], [0], [0, 0, 1, 0], [], []>} : vector<8x32xf32>, vector<8x32xf32>, vector<8x8xf32> -> vector<8x8xf32>
    %cst_20 = arith.constant 0.176776692 : f32
    %36 = vector.broadcast %cst_20 : f32 to vector<8x8xf32>
    %37 = arith.mulf %36, %35 : vector<8x8xf32>
    %38 = vector.broadcast %3 : vector<1x8xf32> to vector<8x8xf32>
    %39 = arith.addf %37, %38 : vector<8x8xf32>
    %cst_21 = arith.constant dense<0xFF800000> : vector<8xf32>
    %40 = vector.multi_reduction <maximumf>, %39, %cst_21 [1] : vector<8x8xf32> to vector<8xf32>
    %41 = vector.shape_cast %40 : vector<8xf32> to vector<8x1xf32>
    %42 = vector.broadcast %41 : vector<8x1xf32> to vector<8x8xf32>
    %43 = arith.subf %39, %42 : vector<8x8xf32>
    %44 = math.exp %43 : vector<8x8xf32>
    %cst_22 = arith.constant dense<0.000000e+00> : vector<8xf32>
    %45 = vector.multi_reduction <add>, %44, %cst_22 [1] : vector<8x8xf32> to vector<8xf32>
    %46 = vector.shape_cast %45 : vector<8xf32> to vector<8x1xf32>
    %47 = tpu.reciprocal %46 : vector<8x1xf32> -> vector<8x1xf32>
    %48 = vector.broadcast %47 : vector<8x1xf32> to vector<8x8xf32>
    %49 = arith.mulf %44, %48 : vector<8x8xf32>
    %cst_23 = arith.constant dense<0.000000e+00> : vector<8x32xf32>
    %50 = tpu.matmul %49, %34, %cst_23 {dimension_numbers = #tpu.dot_dimension_numbers<[1], [0], [0], [1], [0, 0, 1, 1], [], []>} : vector<8x8xf32>, vector<8x32xf32>, vector<8x32xf32> -> vector<8x32xf32>
    %c0_24 = arith.constant 0 : index
    %c0_25 = arith.constant 0 : index
    %c32 = arith.constant 32 : index
    %51 = vector.load %arg5[%c0_24, %c0_25, %c32] : memref<1x8x128xf32, #tpu.memory_space<vmem>>, vector<1x8x32xf32>
    %52 = vector.shape_cast %51 : vector<1x8x32xf32> to vector<8x32xf32>
    %53 = vector.shape_cast %50 : vector<8x32xf32> to vector<1x8x32xf32>
    tpu.vector_store %arg5[%c0_24, %c0_25, %c32], %53 {strides = array<i32>} : memref<1x8x128xf32, #tpu.memory_space<vmem>>, vector<1x8x32xf32>,
    %54 = vector.extract_strided_slice %5 {offsets = [0, 64], sizes = [8, 32], strides = [1, 1]} : vector<8x128xf32> to vector<8x32xf32>
    %55 = vector.extract_strided_slice %7 {offsets = [0, 64], sizes = [8, 32], strides = [1, 1]} : vector<8x128xf32> to vector<8x32xf32>
    %56 = vector.extract_strided_slice %9 {offsets = [0, 64], sizes = [8, 32], strides = [1, 1]} : vector<8x128xf32> to vector<8x32xf32>
    %cst_26 = arith.constant dense<0.000000e+00> : vector<8x8xf32>
    %57 = tpu.matmul %54, %55, %cst_26 {dimension_numbers = #tpu.dot_dimension_numbers<[1], [1], [0], [0], [0, 0, 1, 0], [], []>} : vector<8x32xf32>, vector<8x32xf32>, vector<8x8xf32> -> vector<8x8xf32>
    %cst_27 = arith.constant 0.176776692 : f32
    %58 = vector.broadcast %cst_27 : f32 to vector<8x8xf32>
    %59 = arith.mulf %58, %57 : vector<8x8xf32>
    %60 = vector.broadcast %3 : vector<1x8xf32> to vector<8x8xf32>
    %61 = arith.addf %59, %60 : vector<8x8xf32>
    %cst_28 = arith.constant dense<0xFF800000> : vector<8xf32>
    %62 = vector.multi_reduction <maximumf>, %61, %cst_28 [1] : vector<8x8xf32> to vector<8xf32>
    %63 = vector.shape_cast %62 : vector<8xf32> to vector<8x1xf32>
    %64 = vector.broadcast %63 : vector<8x1xf32> to vector<8x8xf32>
    %65 = arith.subf %61, %64 : vector<8x8xf32>
    %66 = math.exp %65 : vector<8x8xf32>
    %cst_29 = arith.constant dense<0.000000e+00> : vector<8xf32>
    %67 = vector.multi_reduction <add>, %66, %cst_29 [1] : vector<8x8xf32> to vector<8xf32>
    %68 = vector.shape_cast %67 : vector<8xf32> to vector<8x1xf32>
    %69 = tpu.reciprocal %68 : vector<8x1xf32> -> vector<8x1xf32>
    %70 = vector.broadcast %69 : vector<8x1xf32> to vector<8x8xf32>
    %71 = arith.mulf %66, %70 : vector<8x8xf32>
    %cst_30 = arith.constant dense<0.000000e+00> : vector<8x32xf32>
    %72 = tpu.matmul %71, %56, %cst_30 {dimension_numbers = #tpu.dot_dimension_numbers<[1], [0], [0], [1], [0, 0, 1, 1], [], []>} : vector<8x8xf32>, vector<8x32xf32>, vector<8x32xf32> -> vector<8x32xf32>
    %c0_31 = arith.constant 0 : index
    %c0_32 = arith.constant 0 : index
    %c64 = arith.constant 64 : index
    %73 = vector.load %arg5[%c0_31, %c0_32, %c64] : memref<1x8x128xf32, #tpu.memory_space<vmem>>, vector<1x8x32xf32>
    %74 = vector.shape_cast %73 : vector<1x8x32xf32> to vector<8x32xf32>
    %75 = vector.shape_cast %72 : vector<8x32xf32> to vector<1x8x32xf32>
    tpu.vector_store %arg5[%c0_31, %c0_32, %c64], %75 {strides = array<i32>} : memref<1x8x128xf32, #tpu.memory_space<vmem>>, vector<1x8x32xf32>,
    %76 = vector.extract_strided_slice %5 {offsets = [0, 96], sizes = [8, 32], strides = [1, 1]} : vector<8x128xf32> to vector<8x32xf32>
    %77 = vector.extract_strided_slice %7 {offsets = [0, 96], sizes = [8, 32], strides = [1, 1]} : vector<8x128xf32> to vector<8x32xf32>
    %78 = vector.extract_strided_slice %9 {offsets = [0, 96], sizes = [8, 32], strides = [1, 1]} : vector<8x128xf32> to vector<8x32xf32>
    %cst_33 = arith.constant dense<0.000000e+00> : vector<8x8xf32>
    %79 = tpu.matmul %76, %77, %cst_33 {dimension_numbers = #tpu.dot_dimension_numbers<[1], [1], [0], [0], [0, 0, 1, 0], [], []>} : vector<8x32xf32>, vector<8x32xf32>, vector<8x8xf32> -> vector<8x8xf32>
    %cst_34 = arith.constant 0.176776692 : f32
    %80 = vector.broadcast %cst_34 : f32 to vector<8x8xf32>
    %81 = arith.mulf %80, %79 : vector<8x8xf32>
    %82 = vector.broadcast %3 : vector<1x8xf32> to vector<8x8xf32>
    %83 = arith.addf %81, %82 : vector<8x8xf32>
    %cst_35 = arith.constant dense<0xFF800000> : vector<8xf32>
    %84 = vector.multi_reduction <maximumf>, %83, %cst_35 [1] : vector<8x8xf32> to vector<8xf32>
    %85 = vector.shape_cast %84 : vector<8xf32> to vector<8x1xf32>
    %86 = vector.broadcast %85 : vector<8x1xf32> to vector<8x8xf32>
    %87 = arith.subf %83, %86 : vector<8x8xf32>
    %88 = math.exp %87 : vector<8x8xf32>
    %cst_36 = arith.constant dense<0.000000e+00> : vector<8xf32>
    %89 = vector.multi_reduction <add>, %88, %cst_36 [1] : vector<8x8xf32> to vector<8xf32>
    %90 = vector.shape_cast %89 : vector<8xf32> to vector<8x1xf32>
    %91 = tpu.reciprocal %90 : vector<8x1xf32> -> vector<8x1xf32>
    %92 = vector.broadcast %91 : vector<8x1xf32> to vector<8x8xf32>
    %93 = arith.mulf %88, %92 : vector<8x8xf32>
    %cst_37 = arith.constant dense<0.000000e+00> : vector<8x32xf32>
    %94 = tpu.matmul %93, %78, %cst_37 {dimension_numbers = #tpu.dot_dimension_numbers<[1], [0], [0], [1], [0, 0, 1, 1], [], []>} : vector<8x8xf32>, vector<8x32xf32>, vector<8x32xf32> -> vector<8x32xf32>
    %c0_38 = arith.constant 0 : index
    %c0_39 = arith.constant 0 : index
    %c96 = arith.constant 96 : index
    %95 = vector.load %arg5[%c0_38, %c0_39, %c96] : memref<1x8x128xf32, #tpu.memory_space<vmem>>, vector<1x8x32xf32>
    %96 = vector.shape_cast %95 : vector<1x8x32xf32> to vector<8x32xf32>
    %97 = vector.shape_cast %94 : vector<8x32xf32> to vector<1x8x32xf32>
    tpu.vector_store %arg5[%c0_38, %c0_39, %c96], %97 {strides = array<i32>} : memref<1x8x128xf32, #tpu.memory_space<vmem>>, vector<1x8x32xf32>,
    return
  }
  func.func @transform_0(%arg0: i32) -> (i32, i32, i32) {
    %c0_i32 = arith.constant 0 : i32
    %c0_i32_0 = arith.constant 0 : i32
    %c0_i32_1 = arith.constant 0 : i32
    return %arg0, %c0_i32, %c0_i32_0 : i32, i32, i32
  }
  func.func @transform_1(%arg0: i32) -> (i32, i32, i32) {
    %c0_i32 = arith.constant 0 : i32
    %c0_i32_0 = arith.constant 0 : i32
    %c0_i32_1 = arith.constant 0 : i32
    return %arg0, %c0_i32, %c0_i32_0 : i32, i32, i32
  }
  func.func @transform_2(%arg0: i32) -> (i32, i32, i32) {
    %c0_i32 = arith.constant 0 : i32
    %c0_i32_0 = arith.constant 0 : i32
    %c0_i32_1 = arith.constant 0 : i32
    return %arg0, %c0_i32, %c0_i32_0 : i32, i32, i32
  }
  func.func @transform_3(%arg0: i32) -> (i32, i32, i32) {
    %c0_i32 = arith.constant 0 : i32
    %c0_i32_0 = arith.constant 0 : i32
    %c0_i32_1 = arith.constant 0 : i32
    return %arg0, %c0_i32, %c0_i32_0 : i32, i32, i32
  }
  func.func @transform_4(%arg0: i32) -> (i32, i32, i32) {
    %c0_i32 = arith.constant 0 : i32
    %c0_i32_0 = arith.constant 0 : i32
    %c0_i32_1 = arith.constant 0 : i32
    return %arg0, %c0_i32, %c0_i32_0 : i32, i32, i32
  }
}

</mosaic_0001>

<bundles_post_ra>
// kernel: d_full_attention.2
= control target key start
LH: loop header
LB: loop body
LE: loop exit
PB: predicated region body
PF: predicated region fallthrough
CT: control target
= control target key end

     0   :  { %s522_s20 = smov 0   ;;  %s604_s0 = inlined_call_operand.vmem [shape: f32[2,8,128], index: 0, kind: input, shape index: {}]   ;;  %s605_s1 = inlined_call_operand.vmem [shape: f32[128,64], index: 1, kind: input, shape index: {}]   ;;  %s606_s2 = inlined_call_operand.vmem [shape: f32[1,64], index: 2, kind: input, shape index: {}]   ;;  %s607_s3 = inlined_call_operand.vmem [shape: f32[1,64], index: 3, kind: input, shape index: {}]   ;;  %s608_s4 = inlined_call_operand.<no memory space> [shape: f32[1,1], index: 4, kind: input, shape index: {}]   ;;  %s609_s5 = inlined_call_operand.vmem [shape: f32[16,1], index: 5, kind: output, shape index: {}]  }
   0x1   :  { %v10_v0 = vstv %s608_s4 }
   0x2   :  { %11 = vst [vmem:[#allocation2] sm:$0x1] %v10_v0 }
   0x3 LB: > { %s400_s21 = sadd.s32 4294967295, %s485_s20   ;;  %p404_p0 = scmp.ge.s32.totalorder %s485_s20, 1  ;;  %s485_s20 = sphi %s522_s20, %s17_s20  }
   0x4   : > { %p188_p1 = scmp.lt.s32.totalorder %s485_s20, 3 }
   0x6   : > { %p189_p2 = pnand %p404_p0, %p188_p1 }
   0x7   : > { %p214_p3 = scmp.lt.s32.totalorder (!%p189_p2), %s400_s21, 1 }
   0x8   : > { %192 = sbr.rel (%p189_p2) target bundleno = 423 (0x1a7), region = 40 }
   0xd   : > { %v238_v1 = vld [vmem:[%s605_s1 + $0x78] sm:$0xff]  ;;  %v487_v2 = vmov 0.0   ;;  %v237_v3 = vld [vmem:[%s605_s1 + $0x70] sm:$0xff]  ;;  %vm488_vm0 = vmmov 0   ;;  %v236_v4 = vld [vmem:[%s605_s1 + $0x68] sm:$0xff]  ;;  %s611_s21 = smov (!%p214_p3, %s400_s21), 1 }
   0xe   : > { %430 = vmatprep.subr.mxu0 %v487_v2  ;;  %462 = vmatprep.mubr.msk.f32.mxu0 %vm488_vm0, %v487_v2  ;;  %v235_v5 = vld [vmem:[%s605_s1 + $0x60] sm:$0xff]  ;;  %v234_v6 = vld [vmem:[%s605_s1 + $0x58] sm:$0xff]  ;;  %v233_v7 = vld [vmem:[%s605_s1 + $0x50] sm:$0xff]  ;;  %s405_s4 = sshll.u32 %s611_s21, 3  ;;  %vm325_vm1 = vcmask 523264   ;;  %vm345_vm2 = vcmask 7168  }
   0xf   : > { %431 = vmatpush3.msra.mxu0 %v238_v1  ;;  %v232_v8 = vld [vmem:[%s605_s1 + $0x48] sm:$0xff]  ;;  %v231_v9 = vld [vmem:[%s605_s1 + $0x40] sm:$0xff]  ;;  %v230_v10 = vld [vmem:[%s605_s1 + $0x38] sm:$0xff]  ;;  %s217_s30 = scalar_lea.vmem %s604_s0, %s405_s4  ;;  %s221_s14 = scalar_lea.vmem %s609_s5, %s405_s4 }
  0x10   : > { %432 = vmatprep.subr.mxu0 %v487_v2  ;;  %v229_v11 = vld [vmem:[%s605_s1 + $0x30] sm:$0xff]  ;;  %v228_v12 = vld [vmem:[%s605_s1 + $0x28] sm:$0xff]  ;;  %v227_v13 = vld [vmem:[%s605_s1 + $0x20] sm:$0xff] }
  0x11   : > { %433 = vmatpush3.msra.mxu0 %v237_v3  ;;  %v226_v14 = vld [vmem:[%s605_s1 + $0x18] sm:$0xff]  ;;  %v225_v15 = vld [vmem:[%s605_s1 + $0x10] sm:$0xff]  ;;  %v224_v16 = vld [vmem:[%s605_s1 + $0x8] sm:$0xff] }
  0x12   : > { %434 = vmatprep.subr.mxu0 %v487_v2  ;;  %v223_v17 = vld [vmem:[%s605_s1] sm:$0xff] }
  0x13   : > { %435 = vmatpush3.msra.mxu0 %v236_v4  ;;  %v222_v18 = vld [vmem:[%s217_s30] sm:$0xff] }
  0x14   : > { %436 = vmatprep.subr.mxu0 %v487_v2  ;;  %v407_v19 = vld [vmem:[%s606_s2] ss:$0 sm:$0xff] }
  0x15   : > { %437 = vmatpush3.msra.mxu0 %v235_v5  ;;  %v408_v23 = vld [vmem:[%s607_s3] ss:$0 sm:$0xff] }
  0x16   : > { %438 = vmatprep.subr.mxu0 %v487_v2  ;;  %v409_v27 = vld [vmem:[#allocation2] ss:$0 sm:$0xff] }
  0x17   : > { %439 = vmatpush3.msra.mxu0 %v234_v6 }
  0x18   : > { %440 = vmatprep.subr.mxu0 %v487_v2 }
  0x19   : > { %441 = vmatpush3.msra.mxu0 %v233_v7 }
  0x1a   : > { %442 = vmatprep.subr.mxu0 %v487_v2 }
  0x1b   : > { %443 = vmatpush3.msra.mxu0 %v232_v8 }
  0x1c   : > { %444 = vmatprep.subr.mxu0 %v487_v2 }
  0x1d   : > { %445 = vmatpush3.msra.mxu0 %v231_v9 }
  0x1e   : > { %446 = vmatprep.subr.mxu0 %v487_v2 }
  0x1f   : > { %447 = vmatpush3.msra.mxu0 %v230_v10 }
  0x20   : > { %448 = vmatprep.subr.mxu0 %v487_v2 }
  0x21   : > { %449 = vmatpush3.msra.mxu0 %v229_v11 }
  0x22   : > { %450 = vmatprep.subr.mxu0 %v487_v2 }
  0x23   : > { %451 = vmatpush3.msra.mxu0 %v228_v12 }
  0x24   : > { %452 = vmatprep.subr.mxu0 %v487_v2 }
  0x25   : > { %453 = vmatpush3.msra.mxu0 %v227_v13 }
  0x26   : > { %454 = vmatprep.subr.mxu0 %v487_v2 }
  0x27   : > { %455 = vmatpush3.msra.mxu0 %v226_v14 }
  0x28   : > { %456 = vmatprep.subr.mxu0 %v487_v2 }
  0x29   : > { %457 = vmatpush3.msra.mxu0 %v225_v15 }
  0x2a   : > { %458 = vmatprep.subr.mxu0 %v487_v2 }
  0x2b   : > { %459 = vmatpush3.msra.mxu0 %v224_v16 }
  0x2c   : > { %460 = vmatprep.subr.mxu0 %v487_v2 }
  0x2d   : > { %461 = vmatpush3.msra.mxu0 %v223_v17 }
  0x2e   : > { %463 = vmatmul.mubr.f32.vlgmr.msra.gmra.mxu0 %v222_v18 }
  0xee   : > { %v312_v20 = vpop.f32.mrf.mxu0 }
  0xef   : > { %v313_v21 = vadd.f32 %v407_v19, %v312_v20 }
  0xf0   : > { %v464_v22 = vpop.f32.mrf.mxu0 }
  0xf1   : > { %v316_v24 = vmax.f32 %v313_v21, 0.0 }
  0xf3   : > { %v324_v25 = vmul.f32 %v408_v23, %v316_v24 }
  0xf5   : > { %v326_v26 = vsel %vm325_vm1, %v324_v25, 0.0 }
  0xf6   : > { %327 = vadd.xlane.f32.xlu0 %v326_v26 }
 0x17f   : > { %v328_v28 = vpop.xlane.xlu0 %327 }
 0x180   : > { %v336_v29 = vadd.f32 %v409_v27, %v328_v28 }
 0x182   : > { %v410_v30 = vmul.f32 -1.442695, %v336_v29 }
 0x184   : > { %475 = vpow2.f32 %v410_v30 }
 0x191   : > { %v476_v31 = vpop.eup %475 }
 0x192   : > { %v340_v32 = vadd.f32 1.0, %v476_v31 }
 0x194   : > { %477 = vrcp.f32 %v340_v32 }
 0x1a1   : > { %v478_v33 = vpop.eup %477 }
 0x1a2   : > { %v343_v34 = vmax.f32 %v478_v33, 0.01 }
 0x1a4   : > { %v344_v35 = vmin.f32 %v343_v34, 0.99 }
 0x1a6   : > { %346 = vst.msk [vmem:[%s221_s14] sm:$0xff] %vm345_vm2, %v344_v35 }
 0x1a7 PF: > { %s17_s20 = sadd.s32 1, %s485_s20  }
 0x1a8   : > { %p14_p4 = scmp.ge.s32.totalorder %s17_s20, 4  }
 0x1aa   :  { %16 = sbr.rel (!%p14_p4) target bundleno = 3 (0x3), region = 70 }

// kernel: d_full_attention.3
= control target key start
LH: loop header
LB: loop body
LE: loop exit
PB: predicated region body
PF: predicated region fallthrough
CT: control target
= control target key end

     0   :  { %s1169_s15 = smov 0   ;;  %s1276_s0 = inlined_call_operand.vmem [shape: f32[2,1,8], index: 0, kind: input, shape index: {}]   ;;  %s1277_s1 = inlined_call_operand.vmem [shape: f32[2,8,128], index: 1, kind: input, shape index: {}]   ;;  %s1278_s2 = inlined_call_operand.vmem [shape: f32[2,8,128], index: 2, kind: input, shape index: {}]   ;;  %s1279_s3 = inlined_call_operand.vmem [shape: f32[2,8,128], index: 3, kind: input, shape index: {}]   ;;  %s1280_s4 = inlined_call_operand.vmem [shape: f32[2,8,128], index: 4, kind: output, shape index: {}]  }
   0x1 LB: > { %s1023_s16 = sadd.s32 4294967295, %s1137_s15   ;;  %p1027_p0 = scmp.ge.s32.totalorder %s1137_s15, 1  ;;  %s1137_s15 = sphi %s1169_s15, %s14_s15  }
   0x2   : > { %p187_p1 = scmp.lt.s32.totalorder %s1137_s15, 3 }
   0x4   : > { %p188_p2 = pnand %p1027_p0, %p187_p1 }
   0x5   : > { %p222_p3 = scmp.lt.s32.totalorder (!%p188_p2), %s1023_s16, 1  ;;  %s1141_s27 = smov (!%p188_p2), 96  }
   0x6   : > { %191 = sbr.rel (%p188_p2) target bundleno = 1402 (0x57a), region = 36  ;;  %s1142_s28 = smov (!%p188_p2), 64  }
   0x7   : > { %s1143_s29 = smov (!%p188_p2), 32  }
   0xb   : > { %v1139_v0 = vmov 0.0   ;;  %vm1140_vm0 = vmmov 0   ;;  %s1282_s16 = smov (!%p222_p3, %s1023_s16), 1  ;;  %vm246_vm1 = vcmask 261120   ;;  %v325_v3 = vlaneseq }
   0xc   : > { %1062 = vmatprep.subr.mxu0 %v1139_v0  ;;  %1064 = vmatprep.mubr.msk.f32.mxu0 %vm1140_vm0, %v1139_v0  ;;  %s1183_s17 = sshll.u32 %s1282_s16, 3  ;;  %s224_s26 = scalar_lea.vmem %s1276_s0, %s1282_s16  ;;  %vm331_vm2 = vcmask 64512   ;;  %vm589_vm3 = vcmask 523520   ;;  %vm762_vm4 = vcmask 785920   ;;  %vm935_vm5 = vcmask 1048320  }
   0xd   : > { %1067 = vmatprep.subr.mxu1 %v1139_v0  ;;  %1069 = vmatprep.mubr.msk.f32.mxu1 %vm1140_vm0, %v1139_v0  ;;  %s232_s20 = scalar_lea.vmem %s1278_s2, %s1183_s17  ;;  %s228_s23 = scalar_lea.vmem %s1277_s1, %s1183_s17  ;;  %v326_v4 = vshrl.u32 %v325_v3, 7  ;;  %v241_v5 = vld [vmem:[%s224_s26] sm:$0x1] }
   0xe   : > { %v244_v1 = vld [vmem:[%s232_s20] sm:$0xff]  ;;  %v242_v6 = vmul.f32 0.17677669, %v241_v5  ;;  %s236_s6 = scalar_lea.vmem %s1279_s3, %s1183_s17  ;;  %s1239_s9 = scalar_lea.vmem %s1280_s4, %s1183_s17 }
   0xf   : > { %1063 = vmatpush3.xpose.msk.msra.mxu0 %vm246_vm1, %v244_v1  ;;  %v243_v2 = vld [vmem:[%s228_s23] sm:$0xff]  ;;  %v327_v7 = vsub.s32 0, %v326_v4  ;;  %419 = vrot.lane.b32.xlu1 %v244_v1, %s1141_s27 }
  0x10   : > { %1077 = vmatprep.subr.mxu0 %v1139_v0  ;;  %v1215_v19 = vld [vmem:[%s236_s6] sm:$0xff] }
  0x11   : > { %v1201_v8 = vrot.slane %v242_v6, %v327_v7  ;;  %1068 = vmatpush3.msra.mxu1 %v1215_v19 }
  0x12   : > { %1065 = vmatmul.mubr.msk.f32.vlgmr.msra.gmra.mxu0 %vm246_vm1, %v243_v2  ;;  %1072 = vmatprep.subr.mxu1 %v1139_v0 }
  0x13   : > { %1079 = vmatprep.mubr.msk.f32.mxu0 %vm1140_vm0, %v1139_v0  ;;  %417 = vrot.lane.b32.xlu1 %v243_v2, %s1141_s27 }
  0x17   : > { %591 = vrot.lane.b32.xlu1 %v243_v2, %s1142_s28 }
  0x1b   : > { %766 = vrot.lane.b32.xlu1 %v244_v1, %s1143_s29 }
  0x1f   : > { %764 = vrot.lane.b32.xlu1 %v243_v2, %s1143_s29 }
  0x81   : > { %v420_v21 = vpop.permute.xlu1 %419 }
  0x85   : > { %v418_v22 = vpop.permute.xlu1 %417 }
  0x89   : > { %v592_v24 = vpop.permute.xlu1 %591 }
  0x8d   : > { %v767_v27 = vpop.permute.xlu1 %766 }
  0x91   : > { %v765_v28 = vpop.permute.xlu1 %764 }
  0xd2   : > { %v319_v9 = vpop.f32.mrf.mxu0 }
  0xd3   : > { %v323_v10 = vmul.f32 0.17677669, %v319_v9 }
  0xd4   : > { %v1066_v11 = vpop.f32.mrf.mxu0 }
  0xd5   : > { %v330_v12 = vadd.f32 %v1201_v8, %v323_v10 }
  0xd7   : > { %v332_v13 = vsel %vm331_vm2, %v330_v12, -inf }
  0xd8   : > { %333 = vmax.xlane.f32.xlu0 %v332_v13 }
 0x161   : > { %v334_v14 = vpop.xlane.xlu0 %333 }
 0x162   : > { %v335_v15 = vsub.f32 %v330_v12, %v334_v14 }
 0x164   : > { %v336_v16 = vmul.f32 1.442695, %v335_v15 }
 0x166   : > { %1115 = vpow2.f32 %v336_v16 }
 0x173   : > { %v1116_v17 = vpop.eup %1115 }
 0x174   : > { %v338_v18 = vsel %vm331_vm2, %v1116_v17, 0.0 }
 0x175   : > { %339 = vadd.xlane.f32.xlu0 %v338_v18 }
 0x18b   : > { %593 = vrot.lane.b32.xlu0 %v244_v1, %s1142_s28 }
 0x1fe   : > { %v340_v20 = vpop.xlane.xlu0 %339 }
 0x1ff   : > { %1117 = vrcp.f32 %v340_v20 }
 0x202   : > { %v594_v26 = vpop.permute.xlu0 %593 }
 0x20c   : > { %v1118_v23 = vpop.eup %1117 }
 0x20d   : > { %v342_v25 = vmul.f32 %v1118_v23, %v1116_v17 }
 0x20f   : > { %1070 = vmatmul.mubr.msk.f32.vlgmr.msra.gmra.mxu1 %vm331_vm2, %v342_v25 }
 0x210   : > { %1073 = vmatpush3.xpose.msk.msra.mxu1 %vm246_vm1, %v420_v21  ;;  %1074 = vmatprep.mubr.msk.f32.mxu1 %vm1140_vm0, %v1139_v0 }
 0x211   : > { %1082 = vmatprep.subr.mxu1 %v1139_v0 }
 0x213   : > { %1075 = vmatmul.mubr.msk.f32.vlgmr.msra.gmra.mxu1 %vm246_vm1, %v418_v22 }
 0x214   : > { %1083 = vmatpush3.xpose.msk.msra.mxu1 %vm246_vm1, %v594_v26  ;;  %1084 = vmatprep.mubr.msk.f32.mxu1 %vm1140_vm0, %v1139_v0 }
 0x215   : > { %1092 = vmatprep.subr.mxu1 %v1139_v0 }
 0x217   : > { %1085 = vmatmul.mubr.msk.f32.vlgmr.msra.gmra.mxu1 %vm246_vm1, %v592_v24 }
 0x218   : > { %1093 = vmatpush3.xpose.msk.msra.mxu1 %vm246_vm1, %v767_v27  ;;  %1094 = vmatprep.mubr.msk.f32.mxu1 %vm1140_vm0, %v1139_v0 }
 0x21b   : > { %1095 = vmatmul.mubr.msk.f32.vlgmr.msra.gmra.mxu1 %vm246_vm1, %v765_v28 }
 0x2cf   : > { %v412_v29 = vpop.f32.mrf.mxu1 }
 0x2d0   : > { %416 = vst.msk [vmem:[%s1239_s9] sm:$0xff] %vm246_vm1, %v412_v29 }
 0x2d1   : > { %v1071_v30 = vpop.f32.mrf.mxu1 }
 0x2d3   : > { %v491_v31 = vpop.f32.mrf.mxu1 }
 0x2d4   : > { %v495_v32 = vmul.f32 0.17677669, %v491_v31 }
 0x2d5   : > { %v1076_v33 = vpop.f32.mrf.mxu1 }
 0x2d6   : > { %v496_v34 = vadd.f32 %v495_v32, %v1201_v8 }
 0x2d7   : > { %v665_v35 = vpop.f32.mrf.mxu1 }
 0x2d8   : > { %v669_v36 = vmul.f32 0.17677669, %v665_v35  ;;  %v497_v37 = vsel %vm331_vm2, %v496_v34, -inf }
 0x2d9   : > { %498 = vmax.xlane.f32.xlu1 %v497_v37  ;;  %v1086_v38 = vpop.f32.mrf.mxu1 }
 0x2da   : > { %v670_v39 = vadd.f32 %v669_v36, %v1201_v8 }
 0x2db   : > { %v838_v40 = vpop.f32.mrf.mxu1 }
 0x2dc   : > { %v842_v41 = vmul.f32 0.17677669, %v838_v40  ;;  %v671_v42 = vsel %vm331_vm2, %v670_v39, -inf }
 0x2dd   : > { %672 = vmax.xlane.f32.xlu0 %v671_v42  ;;  %v1096_v43 = vpop.f32.mrf.mxu1 }
 0x2de   : > { %v843_v44 = vadd.f32 %v842_v41, %v1201_v8 }
 0x2e0   : > { %v844_v45 = vsel %vm331_vm2, %v843_v44, -inf }
 0x2e1   : > { %845 = vmax.xlane.f32.xlu1 %v844_v45 }
 0x362   : > { %v499_v46 = vpop.xlane.xlu1 %498 }
 0x363   : > { %v500_v47 = vsub.f32 %v496_v34, %v499_v46 }
 0x365   : > { %v501_v48 = vmul.f32 1.442695, %v500_v47 }
 0x366   : > { %v673_v49 = vpop.xlane.xlu0 %672 }
 0x367   : > { %1119 = vpow2.f32 %v501_v48  ;;  %v674_v50 = vsub.f32 %v670_v39, %v673_v49 }
 0x369   : > { %v675_v51 = vmul.f32 1.442695, %v674_v50 }
 0x36a   : > { %v846_v56 = vpop.xlane.xlu1 %845 }
 0x36b   : > { %1121 = vpow2.f32 %v675_v51  ;;  %v847_v57 = vsub.f32 %v843_v44, %v846_v56 }
 0x36d   : > { %v848_v58 = vmul.f32 1.442695, %v847_v57 }
 0x36f   : > { %1123 = vpow2.f32 %v848_v58 }
 0x374   : > { %v1120_v52 = vpop.eup %1119 }
 0x375   : > { %v503_v53 = vsel %vm331_vm2, %v1120_v52, 0.0 }
 0x376   : > { %504 = vadd.xlane.f32.xlu1 %v503_v53 }
 0x378   : > { %v1122_v54 = vpop.eup %1121 }
 0x379   : > { %v677_v55 = vsel %vm331_vm2, %v1122_v54, 0.0 }
 0x37a   : > { %678 = vadd.xlane.f32.xlu0 %v677_v55 }
 0x37c   : > { %v1124_v59 = vpop.eup %1123 }
 0x37d   : > { %v850_v60 = vsel %vm331_vm2, %v1124_v59, 0.0 }
 0x387   : > { %682 = vrot.lane.b32.xlu1 %v1215_v19, %s1142_s28 }
 0x390   : > { %509 = vrot.lane.b32.xlu0 %v1215_v19, %s1141_s27 }
 0x3ab   : > { %851 = vadd.xlane.f32.xlu1 %v850_v60 }
 0x3bc   : > { %855 = vrot.lane.b32.xlu1 %v1215_v19, %s1143_s29 }
 0x3ff   : > { %v505_v61 = vpop.xlane.xlu1 %504 }
 0x400   : > { %1125 = vrcp.f32 %v505_v61 }
 0x403   : > { %v679_v62 = vpop.xlane.xlu0 %678  ;;  %v683_v3 = vpop.permute.xlu1 %682 }
 0x404   : > { %1127 = vrcp.f32 %v679_v62 }
 0x407   : > { %v510_v63 = vpop.permute.xlu0 %509 }
 0x408   : > { %1078 = vmatpush3.msra.mxu0 %v510_v63 }
 0x409   : > { %1087 = vmatprep.subr.mxu0 %v1139_v0 }
 0x40d   : > { %v1126_v1 = vpop.eup %1125 }
 0x40e   : > { %v507_v2 = vmul.f32 %v1126_v1, %v1120_v52 }
 0x410   : > { %1080 = vmatmul.mubr.msk.f32.vlgmr.msra.gmra.mxu0 %vm331_vm2, %v507_v2 }
 0x411   : > { %v1128_v4 = vpop.eup %1127  ;;  %1088 = vmatpush3.msra.mxu0 %v683_v3  ;;  %1089 = vmatprep.mubr.msk.f32.mxu0 %vm1140_vm0, %v1139_v0 }
 0x412   : > { %v681_v5 = vmul.f32 %v1128_v4, %v1122_v54  ;;  %1097 = vmatprep.subr.mxu0 %v1139_v0 }
 0x414   : > { %1090 = vmatmul.mubr.msk.f32.vlgmr.msra.gmra.mxu0 %vm331_vm2, %v681_v5 }
 0x415   : > { %1099 = vmatprep.mubr.msk.f32.mxu0 %vm1140_vm0, %v1139_v0 }
 0x434   : > { %v852_v6 = vpop.xlane.xlu1 %851 }
 0x435   : > { %1129 = vrcp.f32 %v852_v6 }
 0x438   : > { %v856_v7 = vpop.permute.xlu1 %855 }
 0x439   : > { %1098 = vmatpush3.msra.mxu0 %v856_v7 }
 0x442   : > { %v1130_v8 = vpop.eup %1129 }
 0x443   : > { %v854_v9 = vmul.f32 %v1130_v8, %v1124_v59 }
 0x445   : > { %1100 = vmatmul.mubr.msk.f32.vlgmr.msra.gmra.mxu0 %vm331_vm2, %v854_v9 }
 0x4d0   : > { %v581_v10 = vpop.f32.mrf.mxu0 }
 0x4d1   : > { %586 = vrot.lane.b32.xlu0 %v581_v10, %s1143_s29 }
 0x4d2   : > { %v1081_v11 = vpop.f32.mrf.mxu0 }
 0x4d4   : > { %v754_v12 = vpop.f32.mrf.mxu0 }
 0x4d5   : > { %759 = vrot.lane.b32.xlu1 %v754_v12, %s1142_s28 }
 0x4d6   : > { %v1091_v13 = vpop.f32.mrf.mxu0 }
 0x505   : > { %v927_v0 = vpop.f32.mrf.mxu0 }
 0x506   : > { %932 = vrot.lane.b32.xlu0 %v927_v0, %s1141_s27 }
 0x507   : > { %v1101_v14 = vpop.f32.mrf.mxu0 }
 0x543   : > { %v587_v15 = vpop.permute.xlu0 %586 }
 0x544   : > { %590 = vst.msk [vmem:[%s1239_s9] sm:$0xff] %vm589_vm3, %v587_v15 }
 0x547   : > { %v760_v16 = vpop.permute.xlu1 %759 }
 0x548   : > { %763 = vst.msk [vmem:[%s1239_s9] sm:$0xff] %vm762_vm4, %v760_v16 }
 0x578   : > { %v933_v17 = vpop.permute.xlu0 %932 }
 0x579   : > { %936 = vst.msk [vmem:[%s1239_s9] sm:$0xff] %vm935_vm5, %v933_v17 }
 0x57a PF: > { %s14_s15 = sadd.s32 1, %s1137_s15  }
 0x57b   : > { %p11_p4 = scmp.ge.s32.totalorder %s14_s15, 4  }
 0x57d   :  { %13 = sbr.rel (!%p11_p4) target bundleno = 1 (0x1), region = 75 }

</bundles_post_ra>
